<compile_context>
chip_gen: v5e
topology: v5e:2x2
jax: 0.10.0
libtpu: 0.0.40
codegen_flags: <defaults>
</compile_context>

<pallas_src>
import jax
import jax.numpy as jnp
from jax.experimental import pallas as pl
from jax.experimental.pallas import tpu as pltpu
import numpy as np

HIDDEN_DIM = 64        # nn.Linear(latent_dim, 64)
DATA_DIM = 1 * 88      # prod(torch.Size([1, 88]))


def _round_up(x, m):
    return ((x + m - 1) // m) * m


def _pick_tm(batch, tm_max):
    """Batch tile: multiple of 8, <= tm_max, chosen to nearly divide `batch`."""
    tm_max = max(8, _round_up(tm_max, 8))
    if batch <= tm_max:
        return _round_up(batch, 8)
    n_tiles = -(-batch // tm_max)                 # ceil(batch / tm_max)
    return _round_up(-(-batch // n_tiles), 8)     # ceil(batch / n_tiles), 8-aligned


def _dec_kernel(z_ref, w1_ref, b1_ref, w2_ref, b2_ref, o_ref):
    # h = tanh(z @ W1 + b1)   -- MXU matmul (f32 accumulation) + EUP tanh
    h = jnp.tanh(
        jnp.dot(z_ref[...], w1_ref[...], preferred_element_type=jnp.float32)
        + b1_ref[...]
    )
    # p = h @ W2 + b2         -- written straight to the 88-wide output tile
    p = (
        jnp.dot(h, w2_ref[...], preferred_element_type=jnp.float32)
        + b2_ref[...]
    )
    o_ref[...] = p.astype(o_ref.dtype)


def dec_forward(z, params, *, tm=1024, force_pallas=False, min_pallas_batch=256):
    """Forward pass of Dec. Returns (p, scale) like the PyTorch module."""
    w1, b1, w2, b2 = params  # w1:(L,64) b1:(1,64) w2:(64,88) b2:(1,88)
    batch, latent_dim = z.shape
    scale = jnp.asarray(0.75, dtype=z.dtype)

    # Tiny-batch fallback: the pallas_call launch costs more than the math.
    if not force_pallas and batch < min_pallas_batch:
        p = jnp.tanh(z @ w1 + b1) @ w2 + b2
        return p.astype(z.dtype), scale

    TM = _pick_tm(batch, tm)
    n_tiles = -(-batch // TM)
    padded_batch = n_tiles * TM
    zp = (
        jnp.pad(z, ((0, padded_batch - batch), (0, 0)))
        if padded_batch != batch
        else z
    )

    p_pad = pl.pallas_call(
        _dec_kernel,
        out_shape=jax.ShapeDtypeStruct((padded_batch, DATA_DIM), z.dtype),
        grid=(n_tiles,),
        in_specs=[
            pl.BlockSpec((TM, latent_dim), lambda i: (i, 0)),           # z tile (streamed)
            pl.BlockSpec((latent_dim, HIDDEN_DIM), lambda i: (0, 0)),   # W1 (resident)
            pl.BlockSpec((1, HIDDEN_DIM), lambda i: (0, 0)),            # b1 (resident)
            pl.BlockSpec((HIDDEN_DIM, DATA_DIM), lambda i: (0, 0)),     # W2 (resident)
            pl.BlockSpec((1, DATA_DIM), lambda i: (0, 0)),              # b2 (resident)
        ],
        out_specs=pl.BlockSpec((TM, DATA_DIM), lambda i: (i, 0)),       # exact 88-wide out
        compiler_params=pltpu.CompilerParams(
            dimension_semantics=("parallel",),
        ),
    )(zp, w1, b1, w2, b2)

    # Only touch the output again if batch padding was actually needed.
    p = p_pad if padded_batch == batch else p_pad[:batch]
    return p, scale


def init_params(key, latent_dim):
    """Deterministic init matching nn.Linear default (uniform +/- 1/sqrt(fan_in)).
    Weights are stored transposed: (in_features, out_features)."""
    k1, k2, k3, k4 = jax.random.split(key, 4)
    bound1 = 1.0 / np.sqrt(latent_dim)
    bound2 = 1.0 / np.sqrt(HIDDEN_DIM)
    w1 = jax.random.uniform(k1, (latent_dim, HIDDEN_DIM), jnp.float32, -bound1, bound1)
    b1 = jax.random.uniform(k2, (1, HIDDEN_DIM), jnp.float32, -bound1, bound1)
    w2 = jax.random.uniform(k3, (HIDDEN_DIM, DATA_DIM), jnp.float32, -bound2, bound2)
    b2 = jax.random.uniform(k4, (1, DATA_DIM), jnp.float32, -bound2, bound2)
    return (w1, b1, w2, b2)


def dec_reference(z, params):
    """Plain-JAX reference for correctness check."""
    w1, b1, w2, b2 = params
    h = jnp.tanh(z @ w1 + b1)
    return h @ w2 + b2


if __name__ == "__main__":
    latent_dim = 32
    key = jax.random.PRNGKey(0)
    kz, kz2, kp = jax.random.split(key, 3)
    params = init_params(kp, latent_dim)

    # --- Pallas path: batch deliberately NOT a multiple of 8 / tile size to
    # exercise TM selection, batch padding, and the final slice. ---
    batch = 1030
    z = jax.random.normal(kz, (batch, latent_dim), dtype=jnp.float32)
    p, scale = dec_forward(z, params, force_pallas=True)
    p = jax.block_until_ready(p)

    assert p.shape == (batch, DATA_DIM)
    assert float(scale) == 0.75
    p_ref = dec_reference(z, params)
    np.testing.assert_allclose(np.asarray(p), np.asarray(p_ref), rtol=1e-4, atol=1e-4)

    # --- Tiny-batch dispatch guard (plain-XLA fallback) ---
    z_small = jax.random.normal(kz2, (10, latent_dim), dtype=jnp.float32)
    p_small, scale_small = dec_forward(z_small, params)
    p_small = jax.block_until_ready(p_small)
    assert p_small.shape == (10, DATA_DIM)
    assert float(scale_small) == 0.75
    np.testing.assert_allclose(
        np.asarray(p_small), np.asarray(dec_reference(z_small, params)),
        rtol=1e-4, atol=1e-4,
    )

    print("KERNEL_OK")
</pallas_src>

<mosaic_0001>
module attributes {stable_mosaic.version = 11 : i64} {
  func.func @_dec_kernel(%arg0: i32, %arg1: memref<520x32xf32, #tpu.memory_space<vmem>>, %arg2: memref<32x64xf32, #tpu.memory_space<vmem>>, %arg3: memref<1x64xf32, #tpu.memory_space<vmem>>, %arg4: memref<64x88xf32, #tpu.memory_space<vmem>>, %arg5: memref<1x88xf32, #tpu.memory_space<vmem>>, %arg6: memref<520x88xf32, #tpu.memory_space<vmem>>) attributes {dimension_semantics = [#tpu.dimension_semantics<parallel>], iteration_bounds = array<i64: 2>, scalar_prefetch = 0 : i64, scratch_operands = 0 : i64, tpu.core_type = #tpu.core_type<tc>, window_params = [{transform_indices = @transform_0, window_bounds = array<i64: 520, 32>}, {pipeline_mode = #tpu.pipeline_mode<synchronous>, transform_indices = @transform_1, window_bounds = array<i64: 32, 64>}, {pipeline_mode = #tpu.pipeline_mode<synchronous>, transform_indices = @transform_2, window_bounds = array<i64: 1, 64>}, {pipeline_mode = #tpu.pipeline_mode<synchronous>, transform_indices = @transform_3, window_bounds = array<i64: 64, 88>}, {pipeline_mode = #tpu.pipeline_mode<synchronous>, transform_indices = @transform_4, window_bounds = array<i64: 1, 88>}, {transform_indices = @transform_5, window_bounds = array<i64: 520, 88>}]} {
    %c0 = arith.constant 0 : index
    %c0_0 = arith.constant 0 : index
    %0 = vector.load %arg1[%c0, %c0_0] : memref<520x32xf32, #tpu.memory_space<vmem>>, vector<520x32xf32>
    %c0_1 = arith.constant 0 : index
    %c0_2 = arith.constant 0 : index
    %1 = vector.load %arg2[%c0_1, %c0_2] : memref<32x64xf32, #tpu.memory_space<vmem>>, vector<32x64xf32>
    %cst = arith.constant dense<0.000000e+00> : vector<520x64xf32>
    %2 = tpu.matmul %0, %1, %cst {dimension_numbers = #tpu.dot_dimension_numbers<[1], [0], [0], [1], [0, 0, 1, 1], [], []>} : vector<520x32xf32>, vector<32x64xf32>, vector<520x64xf32> -> vector<520x64xf32>
    %c0_3 = arith.constant 0 : index
    %c0_4 = arith.constant 0 : index
    %3 = vector.load %arg3[%c0_3, %c0_4] : memref<1x64xf32, #tpu.memory_space<vmem>>, vector<1x64xf32>
    %4 = vector.broadcast %3 : vector<1x64xf32> to vector<520x64xf32>
    %5 = arith.addf %2, %4 : vector<520x64xf32>
    %6 = math.tanh %5 : vector<520x64xf32>
    %c0_5 = arith.constant 0 : index
    %c0_6 = arith.constant 0 : index
    %7 = vector.load %arg4[%c0_5, %c0_6] : memref<64x88xf32, #tpu.memory_space<vmem>>, vector<64x88xf32>
    %cst_7 = arith.constant dense<0.000000e+00> : vector<520x88xf32>
    %8 = tpu.matmul %6, %7, %cst_7 {dimension_numbers = #tpu.dot_dimension_numbers<[1], [0], [0], [1], [0, 0, 1, 1], [], []>} : vector<520x64xf32>, vector<64x88xf32>, vector<520x88xf32> -> vector<520x88xf32>
    %c0_8 = arith.constant 0 : index
    %c0_9 = arith.constant 0 : index
    %9 = vector.load %arg5[%c0_8, %c0_9] : memref<1x88xf32, #tpu.memory_space<vmem>>, vector<1x88xf32>
    %10 = vector.broadcast %9 : vector<1x88xf32> to vector<520x88xf32>
    %11 = arith.addf %8, %10 : vector<520x88xf32>
    %c0_10 = arith.constant 0 : index
    %c0_11 = arith.constant 0 : index
    %12 = vector.load %arg6[%c0_10, %c0_11] : memref<520x88xf32, #tpu.memory_space<vmem>>, vector<520x88xf32>
    tpu.vector_store %arg6[%c0_10, %c0_11], %11 {strides = array<i32>} : memref<520x88xf32, #tpu.memory_space<vmem>>, vector<520x88xf32>,
    return
  }
  func.func @transform_0(%arg0: i32) -> (i32, i32) {
    %c0_i32 = arith.constant 0 : i32
    %c0_i32_0 = arith.constant 0 : i32
    return %arg0, %c0_i32 : i32, i32
  }
  func.func @transform_1(%arg0: i32) -> (i32, i32) {
    %c0_i32 = arith.constant 0 : i32
    %c0_i32_0 = arith.constant 0 : i32
    %c0_i32_1 = arith.constant 0 : i32
    return %c0_i32, %c0_i32_0 : i32, i32
  }
  func.func @transform_2(%arg0: i32) -> (i32, i32) {
    %c0_i32 = arith.constant 0 : i32
    %c0_i32_0 = arith.constant 0 : i32
    %c0_i32_1 = arith.constant 0 : i32
    return %c0_i32, %c0_i32_0 : i32, i32
  }
  func.func @transform_3(%arg0: i32) -> (i32, i32) {
    %c0_i32 = arith.constant 0 : i32
    %c0_i32_0 = arith.constant 0 : i32
    %c0_i32_1 = arith.constant 0 : i32
    return %c0_i32, %c0_i32_0 : i32, i32
  }
  func.func @transform_4(%arg0: i32) -> (i32, i32) {
    %c0_i32 = arith.constant 0 : i32
    %c0_i32_0 = arith.constant 0 : i32
    %c0_i32_1 = arith.constant 0 : i32
    return %c0_i32, %c0_i32_0 : i32, i32
  }
  func.func @transform_5(%arg0: i32) -> (i32, i32) {
    %c0_i32 = arith.constant 0 : i32
    %c0_i32_0 = arith.constant 0 : i32
    return %arg0, %c0_i32 : i32, i32
  }
}

</mosaic_0001>

<bundles_post_ra>
// kernel: tpu_custom_call.1
= control target key start
LH: loop header
LB: loop body
LE: loop exit
PB: predicated region body
PF: predicated region fallthrough
CT: control target
= control target key end

     0   :  { %s1654_s18 = smov 0   ;;  %s2179_s0 = inlined_call_operand.vmem [shape: f32[1040,32], index: 0, kind: input, shape index: {}]   ;;  %s2180_s1 = inlined_call_operand.vmem [shape: f32[32,64], index: 1, kind: input, shape index: {}]   ;;  %s2181_s2 = inlined_call_operand.vmem [shape: f32[1,64], index: 2, kind: input, shape index: {}]   ;;  %s2182_s3 = inlined_call_operand.vmem [shape: f32[64,88], index: 3, kind: input, shape index: {}]   ;;  %s2183_s4 = inlined_call_operand.vmem [shape: f32[1,88], index: 4, kind: input, shape index: {}]   ;;  %s2184_s5 = inlined_call_operand.vmem [shape: f32[1040,88], index: 5, kind: output, shape index: {}]  }
   0x1 LB: > { %s1316_s19 = sadd.s32 4294967295, %s1622_s18   ;;  %p1320_p0 = scmp.ge.s32.totalorder %s1622_s18, 1  ;;  %s1622_s18 = sphi %s1654_s18, %s15_s18  }
   0x2   : > { %p188_p1 = scmp.lt.s32.totalorder %s1622_s18, 3 }
   0x4   : > { %p189_p2 = pnand %p1320_p0, %p188_p1 }
   0x5   : > { %s216_s24 = smul.u32 (!%p189_p2), 65, %s1316_s19 }
   0x6   : > { %192 = sbr.rel (%p189_p2) target bundleno = 793 (0x319), region = 40 }
   0x7   : > { %p217_p3 = scmp.lt.s32.totalorder (!%p189_p2), %s216_s24, 129 }
   0xb   : > { %v296_v0 = vld [vmem:[%s2180_s1 + $0x18] sm:$0xff]  ;;  %v295_v1 = vld [vmem:[%s2180_s1 + $0x10] sm:$0xff]  ;;  %v294_v2 = vld [vmem:[%s2180_s1 + $0x8] sm:$0xff]  ;;  %s2186_s24 = smov (!%p217_p3, %s216_s24), 129  ;;  %vm301_vm0 = vcmask 261120   ;;  %vm786_vm1 = vcmask 523264  }
   0xc   : > { %509 = vmatpush.msra.mxu0 %v296_v0  ;;  %1455 = vmatpush.msra.mxu3 %v296_v0  ;;  %v293_v3 = vld [vmem:[%s2180_s1] sm:$0xff]  ;;  %s1321_s29 = sshll.u32 %s2186_s24, 3  ;;  %v781_v16 = vld [vmem:[%s2182_s3 + $0x38] sm:$0xff]  ;;  %v780_v17 = vld [vmem:[%s2182_s3 + $0x30] sm:$0xff]  ;;  %vm1194_vm2 = vcmask 719872  }
   0xd   : > { %s1682_s7 = scalar_lea.vmem %s2179_s0, %s1321_s29  ;;  %990 = vmatpush.msra.mxu1 %v781_v16  ;;  %v779_v18 = vld [vmem:[%s2182_s3 + $0x28] sm:$0xff]  ;;  %1459 = vmatpush.msra.mxu2 %v781_v16  ;;  %v778_v20 = vld [vmem:[%s2182_s3 + $0x20] sm:$0xff]  ;;  %v777_v21 = vld [vmem:[%s2182_s3 + $0x18] sm:$0xff]  ;;  %s1834_s9 = scalar_lea.vmem %s2184_s5, %s1321_s29 }
   0xe   : > { %510 = vmatpush.msra.mxu0 %v295_v1  ;;  %1456 = vmatpush.msra.mxu3 %v295_v1  ;;  %v228_v4 = vld [vmem:[%s1682_s7] sm:$0xff]  ;;  %v229_v5 = vld [vmem:[%s1682_s7 + $0x8] sm:$0xff]  ;;  %v230_v6 = vld [vmem:[%s1682_s7 + $0x10] sm:$0xff] }
   0xf   : > { %v231_v7 = vld [vmem:[%s1682_s7 + $0x18] sm:$0xff]  ;;  %v232_v8 = vld [vmem:[%s1682_s7 + $0x20] sm:$0xff]  ;;  %v233_v9 = vld [vmem:[%s1682_s7 + $0x28] sm:$0xff]  ;;  %991 = vmatpush.msra.mxu1 %v780_v17  ;;  %1461 = vmatpush.msra.mxu2 %v780_v17 }
  0x10   : > { %511 = vmatpush.msra.mxu0 %v294_v2  ;;  %1457 = vmatpush.msra.mxu3 %v294_v2  ;;  %v234_v10 = vld [vmem:[%s1682_s7 + $0x30] sm:$0xff]  ;;  %v235_v11 = vld [vmem:[%s1682_s7 + $0x38] sm:$0xff]  ;;  %v236_v12 = vld [vmem:[%s1682_s7 + $0x40] sm:$0xff] }
  0x11   : > { %v237_v13 = vld [vmem:[%s1682_s7 + $0x48] sm:$0xff]  ;;  %v238_v14 = vld [vmem:[%s1682_s7 + $0x50] sm:$0xff]  ;;  %v239_v15 = vld [vmem:[%s1682_s7 + $0x58] sm:$0xff]  ;;  %992 = vmatpush.msra.mxu1 %v779_v18  ;;  %1463 = vmatpush.msra.mxu2 %v779_v18 }
  0x12   : > { %512 = vmatpush.msra.mxu0 %v293_v3  ;;  %1458 = vmatpush.msra.mxu3 %v293_v3  ;;  %v240_v19 = vld [vmem:[%s1682_s7 + $0x60] sm:$0xff]  ;;  %v776_v22 = vld [vmem:[%s2182_s3 + $0x10] sm:$0xff]  ;;  %v775_v23 = vld [vmem:[%s2182_s3 + $0x8] sm:$0xff] }
  0x13   : > { %1323 = vmatmul.msk.f32.vlgmr.msra.gmra.mxu0 %vm301_vm0, %v228_v4  ;;  %993 = vmatpush.msra.mxu1 %v778_v20  ;;  %v241_v24 = vld [vmem:[%s1682_s7 + $0x68] sm:$0xff]  ;;  %v774_v25 = vld [vmem:[%s2182_s3] sm:$0xff]  ;;  %v242_v26 = vld [vmem:[%s1682_s7 + $0x70] sm:$0xff] }
  0x14   : > { %1460 = vmatpush.msrb.mxu3 %v781_v16  ;;  %1465 = vmatpush.msra.mxu2 %v778_v20  ;;  %v243_v27 = vld [vmem:[%s1682_s7 + $0x78] sm:$0xff]  ;;  %v1743_v28 = vld [vmem:[%s2181_s2] ss:$0 sm:$0xff]  ;;  %v245_v33 = vld [vmem:[%s1682_s7 + $0x88] sm:$0xff] }
  0x15   : > { %994 = vmatpush.msra.mxu1 %v777_v21  ;;  %v244_v30 = vld [vmem:[%s1682_s7 + $0x80] sm:$0xff]  ;;  %v246_v37 = vld [vmem:[%s1682_s7 + $0x90] sm:$0xff]  ;;  %v247_v41 = vld [vmem:[%s1682_s7 + $0x98] sm:$0xff] }
  0x16   : > { %1462 = vmatpush.msrb.mxu3 %v780_v17  ;;  %1467 = vmatpush.msra.mxu2 %v777_v21  ;;  %v248_v45 = vld [vmem:[%s1682_s7 + $0xa0] sm:$0xff]  ;;  %v249_v49 = vld [vmem:[%s1682_s7 + $0xa8] sm:$0xff]  ;;  %v250_v53 = vld [vmem:[%s1682_s7 + $0xb0] sm:$0xff] }
  0x17   : > { %995 = vmatpush.msra.mxu1 %v776_v22  ;;  %v251_v57 = vld [vmem:[%s1682_s7 + $0xb8] sm:$0xff]  ;;  %v252_v61 = vld [vmem:[%s1682_s7 + $0xc0] sm:$0xff]  ;;  %v253_v1 = vld [vmem:[%s1682_s7 + $0xc8] sm:$0xff] }
  0x18   : > { %1464 = vmatpush.msrb.mxu3 %v779_v18  ;;  %1469 = vmatpush.msra.mxu2 %v776_v22  ;;  %v262_v17 = vld [vmem:[%s1682_s7 + $0x110] sm:$0xff] }
  0x19   : > { %996 = vmatpush.msra.mxu1 %v775_v23 }
  0x1a   : > { %1466 = vmatpush.msrb.mxu3 %v778_v20  ;;  %1471 = vmatpush.msra.mxu2 %v775_v23 }
  0x1b   : > { %1324 = vmatmul.msk.f32.gmra.mxu0 %vm301_vm0, %v229_v5  ;;  %997 = vmatpush.msra.mxu1 %v774_v25  ;;  %v254_v5 = vld [vmem:[%s1682_s7 + $0xd0] sm:$0xff] }
  0x1c   : > { %1468 = vmatpush.msrb.mxu3 %v777_v21  ;;  %1473 = vmatpush.msra.mxu2 %v774_v25 }
  0x1e   : > { %1470 = vmatpush.msrb.mxu3 %v776_v22  ;;  %v263_v22 = vld [vmem:[%s1682_s7 + $0x118] sm:$0xff] }
  0x20   : > { %1472 = vmatpush.msrb.mxu3 %v775_v23 }
  0x22   : > { %1474 = vmatpush.msrb.mxu3 %v774_v25 }
  0x23   : > { %1325 = vmatmul.msk.f32.gmra.mxu0 %vm301_vm0, %v230_v6 }
  0x2b   : > { %1326 = vmatmul.msk.f32.gmra.mxu0 %vm301_vm0, %v231_v7 }
  0x33   : > { %1327 = vmatmul.msk.f32.gmra.mxu0 %vm301_vm0, %v232_v8 }
  0x3b   : > { %1328 = vmatmul.msk.f32.gmra.mxu0 %vm301_vm0, %v233_v9  ;;  %v255_v9 = vld [vmem:[%s1682_s7 + $0xd8] sm:$0xff] }
  0x43   : > { %1329 = vmatmul.msk.f32.gmra.mxu0 %vm301_vm0, %v234_v10 }
  0x4b   : > { %1330 = vmatmul.msk.f32.gmra.mxu0 %vm301_vm0, %v235_v11 }
  0x53   : > { %1331 = vmatmul.msk.f32.gmra.mxu0 %vm301_vm0, %v236_v12  ;;  %v261_v12 = vld [vmem:[%s1682_s7 + $0x108] sm:$0xff] }
  0x54   : > { %1356 = vmatmul.msk.f32.vlgmr.msra.gmra.mxu3 %vm301_vm0, %v261_v12 }
  0x5b   : > { %1332 = vmatmul.msk.f32.gmra.mxu0 %vm301_vm0, %v237_v13 }
  0x5c   : > { %1357 = vmatmul.msk.f32.gmra.mxu3 %vm301_vm0, %v262_v17  ;;  %v273_v17 = vld [vmem:[%s1682_s7 + $0x168] sm:$0xff] }
  0x63   : > { %1333 = vmatmul.msk.f32.gmra.mxu0 %vm301_vm0, %v238_v14  ;;  %v256_v14 = vld [vmem:[%s1682_s7 + $0xe0] sm:$0xff] }
  0x64   : > { %1358 = vmatmul.msk.f32.gmra.mxu3 %vm301_vm0, %v263_v22 }
  0x6b   : > { %1334 = vmatmul.msk.f32.gmra.mxu0 %vm301_vm0, %v239_v15 }
  0x73   : > { %1335 = vmatmul.msk.f32.gmra.mxu0 %vm301_vm0, %v240_v19  ;;  %v257_v19 = vld [vmem:[%s1682_s7 + $0xe8] sm:$0xff] }
  0x7b   : > { %1336 = vmatmul.msk.f32.gmra.mxu0 %vm301_vm0, %v241_v24  ;;  %v258_v24 = vld [vmem:[%s1682_s7 + $0xf0] sm:$0xff] }
  0x83   : > { %1337 = vmatmul.msk.f32.gmra.mxu0 %vm301_vm0, %v242_v26 }
  0x8b   : > { %1338 = vmatmul.msk.f32.gmra.mxu0 %vm301_vm0, %v243_v27  ;;  %v264_v27 = vld [vmem:[%s1682_s7 + $0x120] sm:$0xff] }
  0x8c   : > { %1359 = vmatmul.msk.f32.gmra.mxu3 %vm301_vm0, %v264_v27 }
  0x90   : > { %v514_v29 = vpop.f32.mrf.mxu0 }
  0x91   : > { %v515_v31 = vadd.f32 %v1743_v28, %v514_v29 }
  0x93   : > { %1485 = vtanh.f32 %v515_v31  ;;  %1339 = vmatmul.msk.f32.gmra.mxu0 %vm301_vm0, %v244_v30  ;;  %v259_v30 = vld [vmem:[%s1682_s7 + $0xf8] sm:$0xff] }
  0x98   : > { %v517_v32 = vpop.f32.mrf.mxu0 }
  0x99   : > { %v1486_v34 = vpop.eup %1485  ;;  %v518_v35 = vadd.f32 %v1743_v28, %v517_v32 }
  0x9a   : > { %1388 = vmatmul.msk.f32.vlgmr.msra.gmra.mxu1 %vm786_vm1, %v1486_v34 }
  0x9b   : > { %1487 = vtanh.f32 %v518_v35  ;;  %1340 = vmatmul.msk.f32.gmra.mxu0 %vm301_vm0, %v245_v33  ;;  %v265_v33 = vld [vmem:[%s1682_s7 + $0x128] sm:$0xff]  ;;  %v260_v35 = vld [vmem:[%s1682_s7 + $0x100] sm:$0xff] }
  0x9c   : > { %1360 = vmatmul.msk.f32.gmra.mxu3 %vm301_vm0, %v265_v33 }
  0xa0   : > { %v520_v36 = vpop.f32.mrf.mxu0 }
  0xa1   : > { %v1488_v38 = vpop.eup %1487  ;;  %v521_v39 = vadd.f32 %v1743_v28, %v520_v36 }
  0xa2   : > { %1389 = vmatmul.msk.f32.gmra.mxu1 %vm786_vm1, %v1488_v38  ;;  %v266_v38 = vld [vmem:[%s1682_s7 + $0x130] sm:$0xff] }
  0xa3   : > { %1489 = vtanh.f32 %v521_v39  ;;  %1341 = vmatmul.msk.f32.gmra.mxu0 %vm301_vm0, %v246_v37  ;;  %v1826_v39 = vld [vmem:[%s2183_s4] ss:$0 sm:$0xff] }
  0xa4   : > { %1361 = vmatmul.msk.f32.gmra.mxu3 %vm301_vm0, %v266_v38 }
  0xa8   : > { %v523_v40 = vpop.f32.mrf.mxu0 }
  0xa9   : > { %v1490_v42 = vpop.eup %1489  ;;  %v524_v43 = vadd.f32 %v1743_v28, %v523_v40 }
  0xaa   : > { %1390 = vmatmul.msk.f32.gmra.mxu1 %vm786_vm1, %v1490_v42 }
  0xab   : > { %1491 = vtanh.f32 %v524_v43  ;;  %1342 = vmatmul.msk.f32.gmra.mxu0 %vm301_vm0, %v247_v41 }
  0xb0   : > { %v526_v44 = vpop.f32.mrf.mxu0 }
  0xb1   : > { %v1492_v46 = vpop.eup %1491  ;;  %v527_v47 = vadd.f32 %v1743_v28, %v526_v44 }
  0xb2   : > { %1391 = vmatmul.msk.f32.gmra.mxu1 %vm786_vm1, %v1492_v46 }
  0xb3   : > { %1493 = vtanh.f32 %v527_v47  ;;  %1343 = vmatmul.msk.f32.gmra.mxu0 %vm301_vm0, %v248_v45  ;;  %v267_v45 = vld [vmem:[%s1682_s7 + $0x138] sm:$0xff] }
  0xb4   : > { %1362 = vmatmul.msk.f32.gmra.mxu3 %vm301_vm0, %v267_v45 }
  0xb8   : > { %v529_v48 = vpop.f32.mrf.mxu0 }
  0xb9   : > { %v1494_v50 = vpop.eup %1493  ;;  %v530_v51 = vadd.f32 %v1743_v28, %v529_v48 }
  0xba   : > { %1392 = vmatmul.msk.f32.gmra.mxu1 %vm786_vm1, %v1494_v50 }
  0xbb   : > { %1495 = vtanh.f32 %v530_v51  ;;  %1344 = vmatmul.msk.f32.gmra.mxu0 %vm301_vm0, %v249_v49  ;;  %v268_v51 = vld [vmem:[%s1682_s7 + $0x140] sm:$0xff] }
  0xbc   : > { %1363 = vmatmul.msk.f32.gmra.mxu3 %vm301_vm0, %v268_v51 }
  0xc0   : > { %v532_v52 = vpop.f32.mrf.mxu0 }
  0xc1   : > { %v1496_v54 = vpop.eup %1495  ;;  %v533_v55 = vadd.f32 %v1743_v28, %v532_v52 }
  0xc2   : > { %1393 = vmatmul.msk.f32.gmra.mxu1 %vm786_vm1, %v1496_v54 }
  0xc3   : > { %1497 = vtanh.f32 %v533_v55  ;;  %1345 = vmatmul.msk.f32.gmra.mxu0 %vm301_vm0, %v250_v53 }
  0xc8   : > { %v535_v56 = vpop.f32.mrf.mxu0 }
  0xc9   : > { %v1498_v58 = vpop.eup %1497  ;;  %v536_v59 = vadd.f32 %v1743_v28, %v535_v56 }
  0xca   : > { %1394 = vmatmul.msk.f32.gmra.mxu1 %vm786_vm1, %v1498_v58 }
  0xcb   : > { %1499 = vtanh.f32 %v536_v59  ;;  %1346 = vmatmul.msk.f32.gmra.mxu0 %vm301_vm0, %v251_v57  ;;  %v269_v57 = vld [vmem:[%s1682_s7 + $0x148] sm:$0xff] }
  0xcc   : > { %1364 = vmatmul.msk.f32.gmra.mxu3 %vm301_vm0, %v269_v57  ;;  %v279_v57 = vld [vmem:[%s1682_s7 + $0x198] sm:$0xff] }
  0xd0   : > { %v538_v60 = vpop.f32.mrf.mxu0 }
  0xd1   : > { %v1500_v62 = vpop.eup %1499  ;;  %v539_v63 = vadd.f32 %v1743_v28, %v538_v60 }
  0xd2   : > { %1395 = vmatmul.msk.f32.gmra.mxu1 %vm786_vm1, %v1500_v62 }
  0xd3   : > { %1501 = vtanh.f32 %v539_v63  ;;  %1347 = vmatmul.msk.f32.gmra.mxu0 %vm301_vm0, %v252_v61  ;;  %v270_v63 = vld [vmem:[%s1682_s7 + $0x150] sm:$0xff] }
  0xd4   : > { %1365 = vmatmul.msk.f32.gmra.mxu3 %vm301_vm0, %v270_v63 }
  0xd8   : > { %v541_v0 = vpop.f32.mrf.mxu0 }
  0xd9   : > { %v1502_v2 = vpop.eup %1501  ;;  %v542_v3 = vadd.f32 %v1743_v28, %v541_v0 }
  0xda   : > { %1396 = vmatmul.msk.f32.gmra.mxu1 %vm786_vm1, %v1502_v2 }
  0xdb   : > { %1503 = vtanh.f32 %v542_v3  ;;  %1348 = vmatmul.msk.f32.gmra.mxu0 %vm301_vm0, %v253_v1 }
  0xe0   : > { %v544_v4 = vpop.f32.mrf.mxu0 }
  0xe1   : > { %v1504_v6 = vpop.eup %1503  ;;  %v545_v7 = vadd.f32 %v1743_v28, %v544_v4 }
  0xe2   : > { %1397 = vmatmul.msk.f32.gmra.mxu1 %vm786_vm1, %v1504_v6 }
  0xe3   : > { %1505 = vtanh.f32 %v545_v7  ;;  %1349 = vmatmul.msk.f32.gmra.mxu0 %vm301_vm0, %v254_v5  ;;  %v271_v5 = vld [vmem:[%s1682_s7 + $0x158] sm:$0xff] }
  0xe4   : > { %1366 = vmatmul.msk.f32.gmra.mxu3 %vm301_vm0, %v271_v5 }
  0xe8   : > { %v547_v8 = vpop.f32.mrf.mxu0 }
  0xe9   : > { %v1506_v10 = vpop.eup %1505  ;;  %v548_v11 = vadd.f32 %v1743_v28, %v547_v8 }
  0xea   : > { %1398 = vmatmul.msk.f32.gmra.mxu1 %vm786_vm1, %v1506_v10 }
  0xeb   : > { %1507 = vtanh.f32 %v548_v11  ;;  %1350 = vmatmul.msk.f32.gmra.mxu0 %vm301_vm0, %v255_v9  ;;  %v272_v11 = vld [vmem:[%s1682_s7 + $0x160] sm:$0xff] }
  0xec   : > { %1367 = vmatmul.msk.f32.gmra.mxu3 %vm301_vm0, %v272_v11 }
  0xf0   : > { %v550_v13 = vpop.f32.mrf.mxu0 }
  0xf1   : > { %v1508_v15 = vpop.eup %1507  ;;  %v551_v16 = vadd.f32 %v1743_v28, %v550_v13 }
  0xf2   : > { %1399 = vmatmul.msk.f32.gmra.mxu1 %vm786_vm1, %v1508_v15 }
  0xf3   : > { %1509 = vtanh.f32 %v551_v16  ;;  %1351 = vmatmul.msk.f32.gmra.mxu0 %vm301_vm0, %v256_v14 }
  0xf4   : > { %1368 = vmatmul.msk.f32.gmra.mxu3 %vm301_vm0, %v273_v17 }
  0xf8   : > { %v553_v18 = vpop.f32.mrf.mxu0 }
  0xf9   : > { %v1510_v20 = vpop.eup %1509  ;;  %v554_v21 = vadd.f32 %v1743_v28, %v553_v18 }
  0xfa   : > { %1400 = vmatmul.msk.f32.gmra.mxu1 %vm786_vm1, %v1510_v20 }
  0xfb   : > { %1511 = vtanh.f32 %v554_v21  ;;  %1352 = vmatmul.msk.f32.gmra.mxu0 %vm301_vm0, %v257_v19 }
 0x100   : > { %v556_v23 = vpop.f32.mrf.mxu0 }
 0x101   : > { %v1512_v25 = vpop.eup %1511  ;;  %v557_v26 = vadd.f32 %v1743_v28, %v556_v23  ;;  %v274_v23 = vld [vmem:[%s1682_s7 + $0x170] sm:$0xff] }
 0x102   : > { %1401 = vmatmul.msk.f32.gmra.mxu1 %vm786_vm1, %v1512_v25  ;;  %1369 = vmatmul.msk.f32.gmra.mxu3 %vm301_vm0, %v274_v23 }
 0x103   : > { %1513 = vtanh.f32 %v557_v26  ;;  %1353 = vmatmul.msk.f32.gmra.mxu0 %vm301_vm0, %v258_v24 }
 0x108   : > { %v559_v29 = vpop.f32.mrf.mxu0 }
 0x109   : > { %v1514_v31 = vpop.eup %1513  ;;  %v560_v32 = vadd.f32 %v1743_v28, %v559_v29 }
 0x10a   : > { %1402 = vmatmul.msk.f32.gmra.mxu1 %vm786_vm1, %v1514_v31 }
 0x10b   : > { %1515 = vtanh.f32 %v560_v32  ;;  %1354 = vmatmul.msk.f32.gmra.mxu0 %vm301_vm0, %v259_v30  ;;  %v275_v30 = vld [vmem:[%s1682_s7 + $0x178] sm:$0xff] }
 0x10c   : > { %1370 = vmatmul.msk.f32.gmra.mxu3 %vm301_vm0, %v275_v30 }
 0x110   : > { %v562_v34 = vpop.f32.mrf.mxu0 }
 0x111   : > { %v1516_v36 = vpop.eup %1515  ;;  %v563_v37 = vadd.f32 %v1743_v28, %v562_v34 }
 0x112   : > { %1403 = vmatmul.msk.f32.gmra.mxu1 %vm786_vm1, %v1516_v36  ;;  %v276_v36 = vld [vmem:[%s1682_s7 + $0x180] sm:$0xff] }
 0x113   : > { %1517 = vtanh.f32 %v563_v37  ;;  %1355 = vmatmul.msk.f32.gmra.mxu0 %vm301_vm0, %v260_v35 }
 0x114   : > { %1371 = vmatmul.msk.f32.gmra.mxu3 %vm301_vm0, %v276_v36 }
 0x117   : > { %v999_v40 = vpop.f32.mrf.mxu1 }
 0x118   : > { %v1000_v41 = vadd.f32 %v1826_v39, %v999_v40  ;;  %v565_v42 = vpop.f32.mrf.mxu0 }
 0x119   : > { %v1518_v43 = vpop.eup %1517  ;;  %v566_v44 = vadd.f32 %v1743_v28, %v565_v42 }
 0x11a   : > { %1195 = vst.msk [vmem:[%s1834_s9] sm:$0xff] %vm1194_vm2, %v1000_v41  ;;  %1404 = vmatmul.msk.f32.gmra.mxu1 %vm786_vm1, %v1518_v43  ;;  %v277_v43 = vld [vmem:[%s1682_s7 + $0x188] sm:$0xff] }
 0x11b   : > { %1519 = vtanh.f32 %v566_v44 }
 0x11c   : > { %1372 = vmatmul.msk.f32.gmra.mxu3 %vm301_vm0, %v277_v43 }
 0x11f   : > { %v1002_v46 = vpop.f32.mrf.mxu1 }
 0x120   : > { %v1003_v47 = vadd.f32 %v1826_v39, %v1002_v46  ;;  %v568_v48 = vpop.f32.mrf.mxu0 }
 0x121   : > { %v1520_v49 = vpop.eup %1519  ;;  %v569_v50 = vadd.f32 %v1743_v28, %v568_v48 }
 0x122   : > { %1196 = vst.msk [vmem:[%s1834_s9 + $0x8] sm:$0xff] %vm1194_vm2, %v1003_v47  ;;  %1405 = vmatmul.msk.f32.gmra.mxu1 %vm786_vm1, %v1520_v49  ;;  %v613_v47 = vpop.f32.mrf.mxu3 }
 0x123   : > { %1521 = vtanh.f32 %v569_v50  ;;  %v278_v50 = vld [vmem:[%s1682_s7 + $0x190] sm:$0xff] }
 0x124   : > { %1373 = vmatmul.msk.f32.gmra.mxu3 %vm301_vm0, %v278_v50 }
 0x127   : > { %v1005_v52 = vpop.f32.mrf.mxu1 }
 0x128   : > { %v1006_v53 = vadd.f32 %v1826_v39, %v1005_v52  ;;  %v571_v54 = vpop.f32.mrf.mxu0 }
 0x129   : > { %v1522_v55 = vpop.eup %1521  ;;  %v572_v56 = vadd.f32 %v1743_v28, %v571_v54 }
 0x12a   : > { %1197 = vst.msk [vmem:[%s1834_s9 + $0x10] sm:$0xff] %vm1194_vm2, %v1006_v53  ;;  %1406 = vmatmul.msk.f32.gmra.mxu1 %vm786_vm1, %v1522_v55  ;;  %v616_v54 = vpop.f32.mrf.mxu3 }
 0x12b   : > { %1523 = vtanh.f32 %v572_v56 }
 0x12c   : > { %1374 = vmatmul.msk.f32.gmra.mxu3 %vm301_vm0, %v279_v57 }
 0x12f   : > { %v1008_v58 = vpop.f32.mrf.mxu1 }
 0x130   : > { %v1009_v59 = vadd.f32 %v1826_v39, %v1008_v58  ;;  %v574_v60 = vpop.f32.mrf.mxu0 }
 0x131   : > { %v1524_v61 = vpop.eup %1523  ;;  %v575_v62 = vadd.f32 %v1743_v28, %v574_v60 }
 0x132   : > { %1198 = vst.msk [vmem:[%s1834_s9 + $0x18] sm:$0xff] %vm1194_vm2, %v1009_v59  ;;  %1407 = vmatmul.msk.f32.gmra.mxu1 %vm786_vm1, %v1524_v61  ;;  %v619_v61 = vpop.f32.mrf.mxu3 }
 0x133   : > { %1525 = vtanh.f32 %v575_v62 }
 0x137   : > { %v1011_v0 = vpop.f32.mrf.mxu1 }
 0x138   : > { %v1012_v1 = vadd.f32 %v1826_v39, %v1011_v0  ;;  %v577_v2 = vpop.f32.mrf.mxu0  ;;  %v280_v0 = vld [vmem:[%s1682_s7 + $0x1a0] sm:$0xff] }
 0x139   : > { %v1526_v3 = vpop.eup %1525  ;;  %v578_v4 = vadd.f32 %v1743_v28, %v577_v2  ;;  %1375 = vmatmul.msk.f32.gmra.mxu3 %vm301_vm0, %v280_v0  ;;  %v290_v0 = vld [vmem:[%s1682_s7 + $0x1f0] sm:$0xff] }
 0x13a   : > { %1199 = vst.msk [vmem:[%s1834_s9 + $0x20] sm:$0xff] %vm1194_vm2, %v1012_v1  ;;  %1408 = vmatmul.msk.f32.gmra.mxu1 %vm786_vm1, %v1526_v3 }
 0x13b   : > { %1527 = vtanh.f32 %v578_v4  ;;  %v622_v4 = vpop.f32.mrf.mxu3 }
 0x13f   : > { %v1014_v6 = vpop.f32.mrf.mxu1 }
 0x140   : > { %v1015_v7 = vadd.f32 %v1826_v39, %v1014_v6  ;;  %v580_v8 = vpop.f32.mrf.mxu0 }
 0x141   : > { %v1528_v9 = vpop.eup %1527  ;;  %v581_v10 = vadd.f32 %v1743_v28, %v580_v8 }
 0x142   : > { %1200 = vst.msk [vmem:[%s1834_s9 + $0x28] sm:$0xff] %vm1194_vm2, %v1015_v7  ;;  %1409 = vmatmul.msk.f32.gmra.mxu1 %vm786_vm1, %v1528_v9  ;;  %v281_v7 = vld [vmem:[%s1682_s7 + $0x1a8] sm:$0xff] }
 0x143   : > { %1529 = vtanh.f32 %v581_v10  ;;  %1376 = vmatmul.msk.f32.gmra.mxu3 %vm301_vm0, %v281_v7  ;;  %v625_v11 = vpop.f32.mrf.mxu3 }
 0x147   : > { %v1017_v12 = vpop.f32.mrf.mxu1 }
 0x148   : > { %v1018_v13 = vadd.f32 %v1826_v39, %v1017_v12  ;;  %v583_v14 = vpop.f32.mrf.mxu0 }
 0x149   : > { %v1530_v15 = vpop.eup %1529  ;;  %v584_v16 = vadd.f32 %v1743_v28, %v583_v14  ;;  %v282_v14 = vld [vmem:[%s1682_s7 + $0x1b0] sm:$0xff] }
 0x14a   : > { %1201 = vst.msk [vmem:[%s1834_s9 + $0x30] sm:$0xff] %vm1194_vm2, %v1018_v13  ;;  %1410 = vmatmul.msk.f32.gmra.mxu1 %vm786_vm1, %v1530_v15  ;;  %v614_v15 = vadd.f32 %v1743_v28, %v613_v47 }
 0x14b   : > { %1531 = vtanh.f32 %v584_v16  ;;  %1377 = vmatmul.msk.f32.gmra.mxu3 %vm301_vm0, %v282_v14 }
 0x14f   : > { %v1020_v18 = vpop.f32.mrf.mxu1 }
 0x150   : > { %v1021_v19 = vadd.f32 %v1826_v39, %v1020_v18  ;;  %v586_v20 = vpop.f32.mrf.mxu0  ;;  %v628_v18 = vpop.f32.mrf.mxu3 }
 0x151   : > { %v1532_v21 = vpop.eup %1531  ;;  %v587_v22 = vadd.f32 %v1743_v28, %v586_v20  ;;  %v283_v20 = vld [vmem:[%s1682_s7 + $0x1b8] sm:$0xff]  ;;  %v629_v47 = vadd.f32 %v1743_v28, %v628_v18 }
 0x152   : > { %1202 = vst.msk [vmem:[%s1834_s9 + $0x38] sm:$0xff] %vm1194_vm2, %v1021_v19  ;;  %1411 = vmatmul.msk.f32.gmra.mxu1 %vm786_vm1, %v1532_v21  ;;  %v617_v21 = vadd.f32 %v1743_v28, %v616_v54 }
 0x153   : > { %1533 = vtanh.f32 %v587_v22  ;;  %1378 = vmatmul.msk.f32.gmra.mxu3 %vm301_vm0, %v283_v20 }
 0x157   : > { %v1023_v24 = vpop.f32.mrf.mxu1 }
 0x158   : > { %v1024_v25 = vadd.f32 %v1826_v39, %v1023_v24  ;;  %v589_v26 = vpop.f32.mrf.mxu0  ;;  %v631_v24 = vpop.f32.mrf.mxu3 }
 0x159   : > { %v1534_v27 = vpop.eup %1533  ;;  %v590_v29 = vadd.f32 %v1743_v28, %v589_v26  ;;  %v284_v26 = vld [vmem:[%s1682_s7 + $0x1c0] sm:$0xff] }
 0x15a   : > { %1203 = vst.msk [vmem:[%s1834_s9 + $0x40] sm:$0xff] %vm1194_vm2, %v1024_v25  ;;  %1412 = vmatmul.msk.f32.gmra.mxu1 %vm786_vm1, %v1534_v27  ;;  %v620_v27 = vadd.f32 %v1743_v28, %v619_v61 }
 0x15b   : > { %1535 = vtanh.f32 %v590_v29  ;;  %1379 = vmatmul.msk.f32.gmra.mxu3 %vm301_vm0, %v284_v26 }
 0x15f   : > { %v1026_v31 = vpop.f32.mrf.mxu1 }
 0x160   : > { %v1027_v32 = vadd.f32 %v1826_v39, %v1026_v31  ;;  %v592_v33 = vpop.f32.mrf.mxu0  ;;  %v634_v31 = vpop.f32.mrf.mxu3 }
 0x161   : > { %v1536_v34 = vpop.eup %1535  ;;  %v593_v35 = vadd.f32 %v1743_v28, %v592_v33  ;;  %v285_v33 = vld [vmem:[%s1682_s7 + $0x1c8] sm:$0xff] }
 0x162   : > { %1204 = vst.msk [vmem:[%s1834_s9 + $0x48] sm:$0xff] %vm1194_vm2, %v1027_v32  ;;  %1413 = vmatmul.msk.f32.gmra.mxu1 %vm786_vm1, %v1536_v34  ;;  %v623_v34 = vadd.f32 %v1743_v28, %v622_v4 }
 0x163   : > { %1537 = vtanh.f32 %v593_v35  ;;  %1380 = vmatmul.msk.f32.gmra.mxu3 %vm301_vm0, %v285_v33 }
 0x167   : > { %v1029_v37 = vpop.f32.mrf.mxu1 }
 0x168   : > { %v1030_v38 = vadd.f32 %v1826_v39, %v1029_v37  ;;  %v595_v40 = vpop.f32.mrf.mxu0  ;;  %v637_v37 = vpop.f32.mrf.mxu3 }
 0x169   : > { %v1538_v41 = vpop.eup %1537  ;;  %v596_v42 = vadd.f32 %v1743_v28, %v595_v40  ;;  %v286_v40 = vld [vmem:[%s1682_s7 + $0x1d0] sm:$0xff] }
 0x16a   : > { %1205 = vst.msk [vmem:[%s1834_s9 + $0x50] sm:$0xff] %vm1194_vm2, %v1030_v38  ;;  %1414 = vmatmul.msk.f32.gmra.mxu1 %vm786_vm1, %v1538_v41  ;;  %v626_v41 = vadd.f32 %v1743_v28, %v625_v11 }
 0x16b   : > { %1539 = vtanh.f32 %v596_v42  ;;  %1381 = vmatmul.msk.f32.gmra.mxu3 %vm301_vm0, %v286_v40 }
 0x16f   : > { %v1032_v44 = vpop.f32.mrf.mxu1 }
 0x170   : > { %v1033_v45 = vadd.f32 %v1826_v39, %v1032_v44  ;;  %v598_v46 = vpop.f32.mrf.mxu0  ;;  %v640_v44 = vpop.f32.mrf.mxu3 }
 0x171   : > { %v1540_v48 = vpop.eup %1539  ;;  %v599_v49 = vadd.f32 %v1743_v28, %v598_v46  ;;  %v287_v46 = vld [vmem:[%s1682_s7 + $0x1d8] sm:$0xff]  ;;  %v641_v7 = vadd.f32 %v1743_v28, %v640_v44 }
 0x172   : > { %1206 = vst.msk [vmem:[%s1834_s9 + $0x58] sm:$0xff] %vm1194_vm2, %v1033_v45  ;;  %1415 = vmatmul.msk.f32.gmra.mxu1 %vm786_vm1, %v1540_v48 }
 0x173   : > { %1541 = vtanh.f32 %v599_v49  ;;  %1382 = vmatmul.msk.f32.gmra.mxu3 %vm301_vm0, %v287_v46 }
 0x177   : > { %v1035_v51 = vpop.f32.mrf.mxu1 }
 0x178   : > { %v1036_v52 = vadd.f32 %v1826_v39, %v1035_v51  ;;  %v601_v53 = vpop.f32.mrf.mxu0  ;;  %v643_v50 = vpop.f32.mrf.mxu3 }
 0x179   : > { %v1542_v55 = vpop.eup %1541  ;;  %v602_v56 = vadd.f32 %v1743_v28, %v601_v53  ;;  %v632_v53 = vadd.f32 %v1743_v28, %v631_v24 }
 0x17a   : > { %1207 = vst.msk [vmem:[%s1834_s9 + $0x60] sm:$0xff] %vm1194_vm2, %v1036_v52  ;;  %1416 = vmatmul.msk.f32.gmra.mxu1 %vm786_vm1, %v1542_v55  ;;  %v288_v52 = vld [vmem:[%s1682_s7 + $0x1e0] sm:$0xff] }
 0x17b   : > { %1543 = vtanh.f32 %v602_v56  ;;  %1383 = vmatmul.msk.f32.gmra.mxu3 %vm301_vm0, %v288_v52 }
 0x17f   : > { %v1038_v58 = vpop.f32.mrf.mxu1 }
 0x180   : > { %v1039_v59 = vadd.f32 %v1826_v39, %v1038_v58  ;;  %v604_v60 = vpop.f32.mrf.mxu0  ;;  %v646_v56 = vpop.f32.mrf.mxu3  ;;  %v289_v58 = vld [vmem:[%s1682_s7 + $0x1e8] sm:$0xff] }
 0x181   : > { %v1544_v62 = vpop.eup %1543  ;;  %v605_v63 = vadd.f32 %v1743_v28, %v604_v60  ;;  %v647_v18 = vadd.f32 %v1743_v28, %v646_v56 }
 0x182   : > { %1208 = vst.msk [vmem:[%s1834_s9 + $0x68] sm:$0xff] %vm1194_vm2, %v1039_v59  ;;  %1417 = vmatmul.msk.f32.gmra.mxu1 %vm786_vm1, %v1544_v62  ;;  %v635_v59 = vadd.f32 %v1743_v28, %v634_v31 }
 0x183   : > { %1545 = vtanh.f32 %v605_v63  ;;  %1384 = vmatmul.msk.f32.gmra.mxu3 %vm301_vm0, %v289_v58 }
 0x187   : > { %v1041_v1 = vpop.f32.mrf.mxu1 }
 0x188   : > { %v1042_v2 = vadd.f32 %v1826_v39, %v1041_v1  ;;  %v607_v3 = vpop.f32.mrf.mxu0  ;;  %v649_v62 = vpop.f32.mrf.mxu3  ;;  %v638_v1 = vadd.f32 %v1743_v28, %v637_v37 }
 0x189   : > { %v1546_v5 = vpop.eup %1545  ;;  %v608_v6 = vadd.f32 %v1743_v28, %v607_v3 }
 0x18a   : > { %1209 = vst.msk [vmem:[%s1834_s9 + $0x70] sm:$0xff] %vm1194_vm2, %v1042_v2  ;;  %1418 = vmatmul.msk.f32.gmra.mxu1 %vm786_vm1, %v1546_v5 }
 0x18b   : > { %1547 = vtanh.f32 %v608_v6  ;;  %1385 = vmatmul.msk.f32.gmra.mxu3 %vm301_vm0, %v290_v0  ;;  %v291_v6 = vld [vmem:[%s1682_s7 + $0x1f8] sm:$0xff] }
 0x18f   : > { %v1044_v8 = vpop.f32.mrf.mxu1 }
 0x190   : > { %v1045_v9 = vadd.f32 %v1826_v39, %v1044_v8  ;;  %v610_v10 = vpop.f32.mrf.mxu0  ;;  %v652_v4 = vpop.f32.mrf.mxu3 }
 0x191   : > { %v1548_v12 = vpop.eup %1547  ;;  %v611_v13 = vadd.f32 %v1743_v28, %v610_v10 }
 0x192   : > { %1210 = vst.msk [vmem:[%s1834_s9 + $0x78] sm:$0xff] %vm1194_vm2, %v1045_v9  ;;  %1419 = vmatmul.msk.f32.gmra.mxu1 %vm786_vm1, %v1548_v12  ;;  %v292_v12 = vld [vmem:[%s1682_s7 + $0x200] sm:$0xff] }
 0x193   : > { %1549 = vtanh.f32 %v611_v13  ;;  %1386 = vmatmul.msk.f32.gmra.mxu3 %vm301_vm0, %v291_v6  ;;  %v644_v13 = vadd.f32 %v1743_v28, %v643_v50 }
 0x194   : > { %1551 = vtanh.f32 %v614_v15 }
 0x195   : > { %1553 = vtanh.f32 %v617_v21 }
 0x196   : > { %1555 = vtanh.f32 %v620_v27 }
 0x197   : > { %v1047_v16 = vpop.f32.mrf.mxu1  ;;  %1557 = vtanh.f32 %v623_v34 }
 0x198   : > { %v1048_v17 = vadd.f32 %v1826_v39, %v1047_v16  ;;  %1559 = vtanh.f32 %v626_v41  ;;  %v655_v10 = vpop.f32.mrf.mxu3 }
 0x199   : > { %v1550_v19 = vpop.eup %1549  ;;  %1561 = vtanh.f32 %v629_v47  ;;  %v656_v34 = vadd.f32 %v1743_v28, %v655_v10 }
 0x19a   : > { %1211 = vst.msk [vmem:[%s1834_s9 + $0x80] sm:$0xff] %vm1194_vm2, %v1048_v17  ;;  %1420 = vmatmul.msk.f32.vlgmr.msra.gmra.mxu2 %vm786_vm1, %v1550_v19  ;;  %v1552_v25 = vpop.eup %1551  ;;  %1563 = vtanh.f32 %v632_v53 }
 0x19b   : > { %v1554_v32 = vpop.eup %1553  ;;  %1565 = vtanh.f32 %v635_v59  ;;  %1387 = vmatmul.msk.f32.gmra.mxu3 %vm301_vm0, %v292_v12 }
 0x19c   : > { %v1556_v38 = vpop.eup %1555  ;;  %1567 = vtanh.f32 %v638_v1 }
 0x19d   : > { %v1558_v45 = vpop.eup %1557  ;;  %1569 = vtanh.f32 %v641_v7 }
 0x19e   : > { %v1560_v51 = vpop.eup %1559  ;;  %1571 = vtanh.f32 %v644_v13 }
 0x19f   : > { %v1050_v22 = vpop.f32.mrf.mxu1  ;;  %v1562_v57 = vpop.eup %1561  ;;  %1573 = vtanh.f32 %v647_v18 }
 0x1a0   : > { %v1051_v23 = vadd.f32 %v1826_v39, %v1050_v22  ;;  %v1564_v63 = vpop.eup %1563  ;;  %v658_v16 = vpop.f32.mrf.mxu3 }
 0x1a1   : > { %v1566_v5 = vpop.eup %1565  ;;  %v659_v40 = vadd.f32 %v1743_v28, %v658_v16 }
 0x1a2   : > { %1212 = vst.msk [vmem:[%s1834_s9 + $0x88] sm:$0xff] %vm1194_vm2, %v1051_v23  ;;  %1421 = vmatmul.msk.f32.gmra.mxu2 %vm786_vm1, %v1552_v25  ;;  %v1568_v11 = vpop.eup %1567  ;;  %v650_v23 = vadd.f32 %v1743_v28, %v649_v62 }
 0x1a3   : > { %v1570_v17 = vpop.eup %1569 }
 0x1a4   : > { %v1572_v22 = vpop.eup %1571  ;;  %1575 = vtanh.f32 %v650_v23 }
 0x1a5   : > { %v1574_v27 = vpop.eup %1573 }
 0x1a7   : > { %v1053_v29 = vpop.f32.mrf.mxu1 }
 0x1a8   : > { %v1054_v30 = vadd.f32 %v1826_v39, %v1053_v29  ;;  %v661_v21 = vpop.f32.mrf.mxu3  ;;  %v653_v29 = vadd.f32 %v1743_v28, %v652_v4 }
 0x1aa   : > { %1213 = vst.msk [vmem:[%s1834_s9 + $0x90] sm:$0xff] %vm1194_vm2, %v1054_v30  ;;  %1422 = vmatmul.msk.f32.gmra.mxu2 %vm786_vm1, %v1554_v32  ;;  %v1576_v33 = vpop.eup %1575  ;;  %1577 = vtanh.f32 %v653_v29 }
 0x1ab   : > { %1579 = vtanh.f32 %v656_v34 }
 0x1ac   : > { %1581 = vtanh.f32 %v659_v40 }
 0x1af   : > { %v1056_v35 = vpop.f32.mrf.mxu1 }
 0x1b0   : > { %v1057_v36 = vadd.f32 %v1826_v39, %v1056_v35  ;;  %v664_v26 = vpop.f32.mrf.mxu3 }
 0x1b1   : > { %v665_v50 = vadd.f32 %v1743_v28, %v664_v26  ;;  %v1615_v26 = vld [vmem:[%s2181_s2] ss:$0 sm:$0xff] }
 0x1b2   : > { %1214 = vst.msk [vmem:[%s1834_s9 + $0x98] sm:$0xff] %vm1194_vm2, %v1057_v36  ;;  %1423 = vmatmul.msk.f32.gmra.mxu2 %vm786_vm1, %v1556_v38  ;;  %v1578_v38 = vpop.eup %1577 }
 0x1b3   : > { %v1580_v44 = vpop.eup %1579 }
 0x1b4   : > { %v1582_v47 = vpop.eup %1581 }
 0x1b7   : > { %v1059_v42 = vpop.f32.mrf.mxu1 }
 0x1b8   : > { %v1060_v43 = vadd.f32 %v1826_v39, %v1059_v42  ;;  %v667_v32 = vpop.f32.mrf.mxu3 }
 0x1ba   : > { %1215 = vst.msk [vmem:[%s1834_s9 + $0xa0] sm:$0xff] %vm1194_vm2, %v1060_v43  ;;  %1424 = vmatmul.msk.f32.gmra.mxu2 %vm786_vm1, %v1558_v45  ;;  %v662_v45 = vadd.f32 %v1743_v28, %v661_v21 }
 0x1bc   : > { %1583 = vtanh.f32 %v662_v45 }
 0x1bd   : > { %1585 = vtanh.f32 %v665_v50 }
 0x1bf   : > { %v1062_v48 = vpop.f32.mrf.mxu1 }
 0x1c0   : > { %v1063_v49 = vadd.f32 %v1826_v39, %v1062_v48  ;;  %v670_v37 = vpop.f32.mrf.mxu3 }
 0x1c2   : > { %1216 = vst.msk [vmem:[%s1834_s9 + $0xa8] sm:$0xff] %vm1194_vm2, %v1063_v49  ;;  %1425 = vmatmul.msk.f32.gmra.mxu2 %vm786_vm1, %v1560_v51  ;;  %v1584_v52 = vpop.eup %1583 }
 0x1c7   : > { %v1065_v54 = vpop.f32.mrf.mxu1 }
 0x1c8   : > { %v1066_v55 = vadd.f32 %v1826_v39, %v1065_v54  ;;  %v673_v43 = vpop.f32.mrf.mxu3 }
 0x1c9   : > { %v674_v1 = vadd.f32 %v1743_v28, %v673_v43 }
 0x1ca   : > { %1217 = vst.msk [vmem:[%s1834_s9 + $0xb0] sm:$0xff] %vm1194_vm2, %v1066_v55  ;;  %1426 = vmatmul.msk.f32.gmra.mxu2 %vm786_vm1, %v1562_v57  ;;  %v668_v55 = vadd.f32 %v1743_v28, %v667_v32  ;;  %v1586_v57 = vpop.eup %1585 }
 0x1cc   : > { %1587 = vtanh.f32 %v668_v55 }
 0x1cf   : > { %v1068_v60 = vpop.f32.mrf.mxu1 }
 0x1d0   : > { %v1069_v61 = vadd.f32 %v1826_v39, %v1068_v60  ;;  %v676_v46 = vpop.f32.mrf.mxu3  ;;  %v671_v60 = vadd.f32 %v1743_v28, %v670_v37 }
 0x1d1   : > { %v677_v6 = vadd.f32 %v1743_v28, %v676_v46 }
 0x1d2   : > { %1218 = vst.msk [vmem:[%s1834_s9 + $0xb8] sm:$0xff] %vm1194_vm2, %v1069_v61  ;;  %1427 = vmatmul.msk.f32.gmra.mxu2 %vm786_vm1, %v1564_v63  ;;  %v1588_v62 = vpop.eup %1587  ;;  %1589 = vtanh.f32 %v671_v60 }
 0x1d3   : > { %1591 = vtanh.f32 %v674_v1 }
 0x1d4   : > { %1593 = vtanh.f32 %v677_v6 }
 0x1d7   : > { %v1071_v2 = vpop.f32.mrf.mxu1 }
 0x1d8   : > { %v1072_v3 = vadd.f32 %v1826_v39, %v1071_v2  ;;  %v679_v51 = vpop.f32.mrf.mxu3 }
 0x1da   : > { %1219 = vst.msk [vmem:[%s1834_s9 + $0xc0] sm:$0xff] %vm1194_vm2, %v1072_v3  ;;  %1428 = vmatmul.msk.f32.gmra.mxu2 %vm786_vm1, %v1566_v5  ;;  %v1590_v3 = vpop.eup %1589 }
 0x1df   : > { %v1074_v8 = vpop.f32.mrf.mxu1 }
 0x1e0   : > { %v1075_v9 = vadd.f32 %v1826_v39, %v1074_v8  ;;  %v682_v56 = vpop.f32.mrf.mxu3  ;;  %v1592_v8 = vpop.eup %1591 }
 0x1e1   : > { %v1594_v13 = vpop.eup %1593  ;;  %v683_v16 = vadd.f32 %v1743_v28, %v682_v56 }
 0x1e2   : > { %1220 = vst.msk [vmem:[%s1834_s9 + $0xc8] sm:$0xff] %vm1194_vm2, %v1075_v9  ;;  %1429 = vmatmul.msk.f32.gmra.mxu2 %vm786_vm1, %v1568_v11  ;;  %v680_v11 = vadd.f32 %v1743_v28, %v679_v51 }
 0x1e4   : > { %1595 = vtanh.f32 %v680_v11 }
 0x1e5   : > { %1597 = vtanh.f32 %v683_v16 }
 0x1e7   : > { %v1077_v14 = vpop.f32.mrf.mxu1 }
 0x1e8   : > { %v1078_v15 = vadd.f32 %v1826_v39, %v1077_v14  ;;  %v685_v61 = vpop.f32.mrf.mxu3 }
 0x1e9   : > { %v686_v21 = vadd.f32 %v1743_v28, %v685_v61 }
 0x1ea   : > { %1221 = vst.msk [vmem:[%s1834_s9 + $0xd0] sm:$0xff] %vm1194_vm2, %v1078_v15  ;;  %1430 = vmatmul.msk.f32.gmra.mxu2 %vm786_vm1, %v1570_v17  ;;  %v1596_v18 = vpop.eup %1595 }
 0x1eb   : > { %v1598_v23 = vpop.eup %1597  ;;  %1599 = vtanh.f32 %v686_v21 }
 0x1ef   : > { %v1080_v19 = vpop.f32.mrf.mxu1 }
 0x1f0   : > { %v1081_v20 = vadd.f32 %v1826_v39, %v1080_v19  ;;  %v688_v2 = vpop.f32.mrf.mxu3 }
 0x1f1   : > { %v1600_v28 = vpop.eup %1599 }
 0x1f2   : > { %1222 = vst.msk [vmem:[%s1834_s9 + $0xd8] sm:$0xff] %vm1194_vm2, %v1081_v20  ;;  %1431 = vmatmul.msk.f32.gmra.mxu2 %vm786_vm1, %v1572_v22 }
 0x1f7   : > { %v1083_v24 = vpop.f32.mrf.mxu1 }
 0x1f8   : > { %v1084_v25 = vadd.f32 %v1826_v39, %v1083_v24  ;;  %v691_v7 = vpop.f32.mrf.mxu3 }
 0x1fa   : > { %1223 = vst.msk [vmem:[%s1834_s9 + $0xe0] sm:$0xff] %vm1194_vm2, %v1084_v25  ;;  %1432 = vmatmul.msk.f32.gmra.mxu2 %vm786_vm1, %v1574_v27  ;;  %v689_v27 = vadd.f32 %v1615_v26, %v688_v2 }
 0x1fc   : > { %1601 = vtanh.f32 %v689_v27 }
 0x1ff   : > { %v1086_v30 = vpop.f32.mrf.mxu1 }
 0x200   : > { %v1087_v31 = vadd.f32 %v1826_v39, %v1086_v30  ;;  %v694_v12 = vpop.f32.mrf.mxu3 }
 0x202   : > { %1224 = vst.msk [vmem:[%s1834_s9 + $0xe8] sm:$0xff] %vm1194_vm2, %v1087_v31  ;;  %1433 = vmatmul.msk.f32.gmra.mxu2 %vm786_vm1, %v1576_v33  ;;  %v692_v31 = vadd.f32 %v1615_v26, %v691_v7  ;;  %v1602_v34 = vpop.eup %1601 }
 0x204   : > { %1603 = vtanh.f32 %v692_v31 }
 0x207   : > { %v1089_v35 = vpop.f32.mrf.mxu1 }
 0x208   : > { %v1090_v36 = vadd.f32 %v1826_v39, %v1089_v35  ;;  %v697_v17 = vpop.f32.mrf.mxu3 }
 0x20a   : > { %1225 = vst.msk [vmem:[%s1834_s9 + $0xf0] sm:$0xff] %vm1194_vm2, %v1090_v36  ;;  %1434 = vmatmul.msk.f32.gmra.mxu2 %vm786_vm1, %v1578_v38  ;;  %v695_v38 = vadd.f32 %v1615_v26, %v694_v12  ;;  %v1604_v40 = vpop.eup %1603 }
 0x20f   : > { %v1092_v41 = vpop.f32.mrf.mxu1 }
 0x210   : > { %v1093_v42 = vadd.f32 %v1826_v39, %v1092_v41  ;;  %v700_v22 = vpop.f32.mrf.mxu3 }
 0x212   : > { %1226 = vst.msk [vmem:[%s1834_s9 + $0xf8] sm:$0xff] %vm1194_vm2, %v1093_v42  ;;  %1435 = vmatmul.msk.f32.gmra.mxu2 %vm786_vm1, %v1580_v44  ;;  %v698_v44 = vadd.f32 %v1615_v26, %v697_v17 }
 0x218   : > { %v703_v29 = vpop.f32.mrf.mxu3 }
 0x21a   : > { %1436 = vmatmul.msk.f32.gmra.mxu2 %vm786_vm1, %v1582_v47 }
 0x21d   : > { %v1095_v48 = vpop.f32.mrf.mxu2 }
 0x21e   : > { %v1096_v49 = vadd.f32 %v1826_v39, %v1095_v48  ;;  %v701_v48 = vadd.f32 %v1615_v26, %v700_v22 }
 0x220   : > { %1227 = vst.msk [vmem:[%s1834_s9 + $0x100] sm:$0xff] %vm1194_vm2, %v1096_v49  ;;  %v706_v33 = vpop.f32.mrf.mxu3 }
 0x221   : > { %v707_v35 = vadd.f32 %v1615_v26, %v706_v33 }
 0x222   : > { %1437 = vmatmul.msk.f32.gmra.mxu2 %vm786_vm1, %v1584_v52  ;;  %v704_v52 = vadd.f32 %v1615_v26, %v703_v29 }
 0x223   : > { %1605 = vtanh.f32 %v707_v35 }
 0x224   : > { %1607 = vtanh.f32 %v695_v38 }
 0x225   : > { %v1098_v53 = vpop.f32.mrf.mxu2  ;;  %1609 = vtanh.f32 %v698_v44 }
 0x226   : > { %v1099_v54 = vadd.f32 %v1826_v39, %v1098_v53  ;;  %1611 = vtanh.f32 %v701_v48 }
 0x227   : > { %1613 = vtanh.f32 %v704_v52 }
 0x228   : > { %1228 = vst.msk [vmem:[%s1834_s9 + $0x108] sm:$0xff] %vm1194_vm2, %v1099_v54 }
 0x229   : > { %v1606_v41 = vpop.eup %1605 }
 0x22a   : > { %1438 = vmatmul.msk.f32.gmra.mxu2 %vm786_vm1, %v1586_v57  ;;  %1452 = vmatmul.msk.f32.vlgmr.msrb.gmra.mxu3 %vm786_vm1, %v1606_v41  ;;  %v1608_v45 = vpop.eup %1607 }
 0x22b   : > { %v1610_v49 = vpop.eup %1609 }
 0x22c   : > { %v1612_v53 = vpop.eup %1611 }
 0x22d   : > { %v1101_v58 = vpop.f32.mrf.mxu2  ;;  %v1614_v56 = vpop.eup %1613 }
 0x22e   : > { %v1102_v59 = vadd.f32 %v1826_v39, %v1101_v58 }
 0x230   : > { %1229 = vst.msk [vmem:[%s1834_s9 + $0x110] sm:$0xff] %vm1194_vm2, %v1102_v59 }
 0x232   : > { %1439 = vmatmul.msk.f32.gmra.mxu2 %vm786_vm1, %v1588_v62 }
 0x235   : > { %v1104_v63 = vpop.f32.mrf.mxu2 }
 0x236   : > { %v1105_v0 = vadd.f32 %v1826_v39, %v1104_v63 }
 0x238   : > { %1230 = vst.msk [vmem:[%s1834_s9 + $0x118] sm:$0xff] %vm1194_vm2, %v1105_v0 }
 0x23a   : > { %1440 = vmatmul.msk.f32.gmra.mxu2 %vm786_vm1, %v1590_v3 }
 0x23d   : > { %v1107_v4 = vpop.f32.mrf.mxu2 }
 0x23e   : > { %v1108_v5 = vadd.f32 %v1826_v39, %v1107_v4 }
 0x240   : > { %1231 = vst.msk [vmem:[%s1834_s9 + $0x120] sm:$0xff] %vm1194_vm2, %v1108_v5 }
 0x242   : > { %1441 = vmatmul.msk.f32.gmra.mxu2 %vm786_vm1, %v1592_v8 }
 0x245   : > { %v1110_v9 = vpop.f32.mrf.mxu2 }
 0x246   : > { %v1111_v10 = vadd.f32 %v1826_v39, %v1110_v9 }
 0x248   : > { %1232 = vst.msk [vmem:[%s1834_s9 + $0x128] sm:$0xff] %vm1194_vm2, %v1111_v10 }
 0x24a   : > { %1442 = vmatmul.msk.f32.gmra.mxu2 %vm786_vm1, %v1594_v13 }
 0x24d   : > { %v1113_v14 = vpop.f32.mrf.mxu2 }
 0x24e   : > { %v1114_v15 = vadd.f32 %v1826_v39, %v1113_v14 }
 0x250   : > { %1233 = vst.msk [vmem:[%s1834_s9 + $0x130] sm:$0xff] %vm1194_vm2, %v1114_v15 }
 0x252   : > { %1443 = vmatmul.msk.f32.gmra.mxu2 %vm786_vm1, %v1596_v18 }
 0x255   : > { %v1116_v19 = vpop.f32.mrf.mxu2 }
 0x256   : > { %v1117_v20 = vadd.f32 %v1826_v39, %v1116_v19 }
 0x258   : > { %1234 = vst.msk [vmem:[%s1834_s9 + $0x138] sm:$0xff] %vm1194_vm2, %v1117_v20 }
 0x25a   : > { %1444 = vmatmul.msk.f32.gmra.mxu2 %vm786_vm1, %v1598_v23 }
 0x25d   : > { %v1119_v24 = vpop.f32.mrf.mxu2 }
 0x25e   : > { %v1120_v25 = vadd.f32 %v1826_v39, %v1119_v24 }
 0x260   : > { %1235 = vst.msk [vmem:[%s1834_s9 + $0x140] sm:$0xff] %vm1194_vm2, %v1120_v25 }
 0x262   : > { %1445 = vmatmul.msk.f32.gmra.mxu2 %vm786_vm1, %v1600_v28 }
 0x265   : > { %v1122_v30 = vpop.f32.mrf.mxu2 }
 0x266   : > { %v1123_v32 = vadd.f32 %v1826_v39, %v1122_v30 }
 0x268   : > { %1236 = vst.msk [vmem:[%s1834_s9 + $0x148] sm:$0xff] %vm1194_vm2, %v1123_v32 }
 0x26a   : > { %1446 = vmatmul.msk.f32.gmra.mxu2 %vm786_vm1, %v1602_v34 }
 0x26d   : > { %v1125_v36 = vpop.f32.mrf.mxu2 }
 0x26e   : > { %v1126_v37 = vadd.f32 %v1826_v39, %v1125_v36 }
 0x270   : > { %1237 = vst.msk [vmem:[%s1834_s9 + $0x150] sm:$0xff] %vm1194_vm2, %v1126_v37 }
 0x272   : > { %1447 = vmatmul.msk.f32.gmra.mxu2 %vm786_vm1, %v1604_v40 }
 0x275   : > { %v1128_v42 = vpop.f32.mrf.mxu2 }
 0x276   : > { %v1129_v43 = vadd.f32 %v1826_v39, %v1128_v42 }
 0x278   : > { %1238 = vst.msk [vmem:[%s1834_s9 + $0x158] sm:$0xff] %vm1194_vm2, %v1129_v43 }
 0x27a   : > { %1448 = vmatmul.msk.f32.gmra.mxu2 %vm786_vm1, %v1608_v45 }
 0x27d   : > { %v1131_v46 = vpop.f32.mrf.mxu2 }
 0x27e   : > { %v1132_v47 = vadd.f32 %v1826_v39, %v1131_v46 }
 0x280   : > { %1239 = vst.msk [vmem:[%s1834_s9 + $0x160] sm:$0xff] %vm1194_vm2, %v1132_v47 }
 0x282   : > { %1449 = vmatmul.msk.f32.gmra.mxu2 %vm786_vm1, %v1610_v49 }
 0x285   : > { %v1134_v50 = vpop.f32.mrf.mxu2 }
 0x286   : > { %v1135_v51 = vadd.f32 %v1826_v39, %v1134_v50 }
 0x288   : > { %1240 = vst.msk [vmem:[%s1834_s9 + $0x168] sm:$0xff] %vm1194_vm2, %v1135_v51 }
 0x28a   : > { %1450 = vmatmul.msk.f32.gmra.mxu2 %vm786_vm1, %v1612_v53 }
 0x28d   : > { %v1137_v54 = vpop.f32.mrf.mxu2 }
 0x28e   : > { %v1138_v55 = vadd.f32 %v1826_v39, %v1137_v54 }
 0x290   : > { %1241 = vst.msk [vmem:[%s1834_s9 + $0x170] sm:$0xff] %vm1194_vm2, %v1138_v55 }
 0x292   : > { %1451 = vmatmul.msk.f32.gmra.mxu2 %vm786_vm1, %v1614_v56 }
 0x295   : > { %v1140_v57 = vpop.f32.mrf.mxu2 }
 0x296   : > { %v1141_v58 = vadd.f32 %v1826_v39, %v1140_v57 }
 0x298   : > { %1242 = vst.msk [vmem:[%s1834_s9 + $0x178] sm:$0xff] %vm1194_vm2, %v1141_v58 }
 0x29d   : > { %v1143_v59 = vpop.f32.mrf.mxu2 }
 0x29e   : > { %v1144_v60 = vadd.f32 %v1826_v39, %v1143_v59 }
 0x2a0   : > { %1243 = vst.msk [vmem:[%s1834_s9 + $0x180] sm:$0xff] %vm1194_vm2, %v1144_v60 }
 0x2a5   : > { %v1146_v61 = vpop.f32.mrf.mxu2 }
 0x2a6   : > { %v1147_v62 = vadd.f32 %v1826_v39, %v1146_v61 }
 0x2a8   : > { %1244 = vst.msk [vmem:[%s1834_s9 + $0x188] sm:$0xff] %vm1194_vm2, %v1147_v62 }
 0x2ad   : > { %v1149_v63 = vpop.f32.mrf.mxu2  ;;  %v1191_v18 = vpop.f32.mrf.mxu3 }
 0x2ae   : > { %v1150_v0 = vadd.f32 %v1826_v39, %v1149_v63  ;;  %v1192_v20 = vadd.f32 %v1826_v39, %v1191_v18 }
 0x2b0   : > { %1245 = vst.msk [vmem:[%s1834_s9 + $0x190] sm:$0xff] %vm1194_vm2, %v1150_v0 }
 0x2b1   : > { %1259 = vst.msk [vmem:[%s1834_s9 + $0x200] sm:$0xff] %vm1194_vm2, %v1192_v20 }
 0x2b5   : > { %v1152_v1 = vpop.f32.mrf.mxu2 }
 0x2b6   : > { %v1153_v2 = vadd.f32 %v1826_v39, %v1152_v1 }
 0x2b8   : > { %1246 = vst.msk [vmem:[%s1834_s9 + $0x198] sm:$0xff] %vm1194_vm2, %v1153_v2 }
 0x2bd   : > { %v1155_v3 = vpop.f32.mrf.mxu2 }
 0x2be   : > { %v1156_v4 = vadd.f32 %v1826_v39, %v1155_v3 }
 0x2c0   : > { %1247 = vst.msk [vmem:[%s1834_s9 + $0x1a0] sm:$0xff] %vm1194_vm2, %v1156_v4 }
 0x2c5   : > { %v1158_v5 = vpop.f32.mrf.mxu2 }
 0x2c6   : > { %v1159_v6 = vadd.f32 %v1826_v39, %v1158_v5 }
 0x2c8   : > { %1248 = vst.msk [vmem:[%s1834_s9 + $0x1a8] sm:$0xff] %vm1194_vm2, %v1159_v6 }
 0x2cd   : > { %v1161_v7 = vpop.f32.mrf.mxu2 }
 0x2ce   : > { %v1162_v8 = vadd.f32 %v1826_v39, %v1161_v7 }
 0x2d0   : > { %1249 = vst.msk [vmem:[%s1834_s9 + $0x1b0] sm:$0xff] %vm1194_vm2, %v1162_v8 }
 0x2d5   : > { %v1164_v9 = vpop.f32.mrf.mxu2 }
 0x2d6   : > { %v1165_v10 = vadd.f32 %v1826_v39, %v1164_v9 }
 0x2d8   : > { %1250 = vst.msk [vmem:[%s1834_s9 + $0x1b8] sm:$0xff] %vm1194_vm2, %v1165_v10 }
 0x2dd   : > { %v1167_v11 = vpop.f32.mrf.mxu2 }
 0x2de   : > { %v1168_v12 = vadd.f32 %v1826_v39, %v1167_v11 }
 0x2e0   : > { %1251 = vst.msk [vmem:[%s1834_s9 + $0x1c0] sm:$0xff] %vm1194_vm2, %v1168_v12 }
 0x2e5   : > { %v1170_v13 = vpop.f32.mrf.mxu2 }
 0x2e6   : > { %v1171_v14 = vadd.f32 %v1826_v39, %v1170_v13 }
 0x2e8   : > { %1252 = vst.msk [vmem:[%s1834_s9 + $0x1c8] sm:$0xff] %vm1194_vm2, %v1171_v14 }
 0x2ed   : > { %v1173_v15 = vpop.f32.mrf.mxu2 }
 0x2ee   : > { %v1174_v16 = vadd.f32 %v1826_v39, %v1173_v15 }
 0x2f0   : > { %1253 = vst.msk [vmem:[%s1834_s9 + $0x1d0] sm:$0xff] %vm1194_vm2, %v1174_v16 }
 0x2f5   : > { %v1176_v17 = vpop.f32.mrf.mxu2 }
 0x2f6   : > { %v1177_v19 = vadd.f32 %v1826_v39, %v1176_v17 }
 0x2f8   : > { %1254 = vst.msk [vmem:[%s1834_s9 + $0x1d8] sm:$0xff] %vm1194_vm2, %v1177_v19 }
 0x2fd   : > { %v1179_v21 = vpop.f32.mrf.mxu2 }
 0x2fe   : > { %v1180_v22 = vadd.f32 %v1826_v39, %v1179_v21 }
 0x300   : > { %1255 = vst.msk [vmem:[%s1834_s9 + $0x1e0] sm:$0xff] %vm1194_vm2, %v1180_v22 }
 0x305   : > { %v1182_v23 = vpop.f32.mrf.mxu2 }
 0x306   : > { %v1183_v24 = vadd.f32 %v1826_v39, %v1182_v23 }
 0x308   : > { %1256 = vst.msk [vmem:[%s1834_s9 + $0x1e8] sm:$0xff] %vm1194_vm2, %v1183_v24 }
 0x30d   : > { %v1185_v25 = vpop.f32.mrf.mxu2 }
 0x30e   : > { %v1186_v26 = vadd.f32 %v1826_v39, %v1185_v25 }
 0x310   : > { %1257 = vst.msk [vmem:[%s1834_s9 + $0x1f0] sm:$0xff] %vm1194_vm2, %v1186_v26 }
 0x315   : > { %v1188_v27 = vpop.f32.mrf.mxu2 }
 0x316   : > { %v1189_v29 = vadd.f32 %v1826_v39, %v1188_v27 }
 0x318   : > { %1258 = vst.msk [vmem:[%s1834_s9 + $0x1f8] sm:$0xff] %vm1194_vm2, %v1189_v29 }
 0x319 PF: > { %s15_s18 = sadd.s32 1, %s1622_s18  }
 0x31a   : > { %p12_p4 = scmp.ge.s32.totalorder %s15_s18, 4  }
 0x31c   :  { %14 = sbr.rel (!%p12_p4) target bundleno = 1 (0x1), region = 70 }

</bundles_post_ra>
